<compile_context>
chip_gen: v7x
topology: tpu7x:2x2x1
jax: 0.10.0
libtpu: 0.0.40
codegen_flags: <defaults>
</compile_context>

<pallas_src>
import functools

import jax
import jax.numpy as jnp
from jax.experimental import pallas as pl
from jax.experimental.pallas import tpu as pltpu

EPS = 1e-5
NEG_SLOPE = 0.1  # LeakyReLU negative_slope
LANES = 128


def _vmem_capacity_bytes():
    """Per-core VMEM capacity; fall back to the smallest generation (v7x)."""
    try:
        return int(pltpu.get_tpu_info().vmem_capacity_bytes)
    except Exception:
        return 64 << 20


def _choose_tile_s(S, C, tile_budget_bytes):
    """Lane-dense spatial tile sized by bytes (target ~2-8 MiB per block)."""
    if S <= LANES:
        return int(S)  # single block; last block dim equals the full array dim
    max_lanes = max(LANES, (tile_budget_bytes // (4 * C)) // LANES * LANES)
    s_floor = (S // LANES) * LANES  # largest 128-multiple <= S (blocks stay in-bounds)
    return int(min(max_lanes, s_floor))


def _stats_kernel(x_ref, sum_ref, sumsq_ref, max_ref,
                  sum_acc, sumsq_acc, max_acc, *, tile_s, rem, acc_lanes, unroll):
    """Streaming per-(b,c) sum / sum-of-squares / max over the spatial axis.

    Hot loop: lane-block loads from the tile + per-lane VALU accumulate into
    (C, acc_lanes) carries.  Cross-lane reduction and the tiny (1, C, 1) output
    writes happen only on the last spatial tile; the ragged tail (S % tile_s)
    is masked in-kernel so x needs no host-side padding.
    """
    j = pl.program_id(1)
    last = pl.num_programs(1) - 1
    n_blk = tile_s // acc_lanes

    @pl.when(j == 0)
    def _():
        sum_acc[...] = jnp.zeros(sum_acc.shape, sum_acc.dtype)
        sumsq_acc[...] = jnp.zeros(sumsq_acc.shape, sumsq_acc.dtype)
        max_acc[...] = jnp.full(max_acc.shape, -jnp.inf, max_acc.dtype)

    def accumulate(masked):
        def body(k, carry):
            s, ss, m = carry
            off = pl.multiple_of(k * acc_lanes, acc_lanes)
            chunk = x_ref[0, :, pl.ds(off, acc_lanes)].astype(jnp.float32)
            if masked:
                lane = jax.lax.broadcasted_iota(jnp.int32, chunk.shape, 1) + off
                keep = lane < rem
                cz = jnp.where(keep, chunk, 0.0)
                cm = jnp.where(keep, chunk, -jnp.inf)
            else:
                cz = chunk
                cm = chunk
            return s + cz, ss + cz * cz, jnp.maximum(m, cm)

        init = (jnp.zeros(sum_acc.shape, jnp.float32),
                jnp.zeros(sumsq_acc.shape, jnp.float32),
                jnp.full(max_acc.shape, -jnp.inf, jnp.float32))
        s, ss, m = jax.lax.fori_loop(0, n_blk, body, init, unroll=unroll)
        sum_acc[...] += s
        sumsq_acc[...] += ss
        max_acc[...] = jnp.maximum(max_acc[...], m)

    if rem == 0:
        accumulate(masked=False)          # every tile is full: no mask math at all
    else:
        @pl.when(j != last)
        def _():
            accumulate(masked=False)      # full tiles: mask-free path

        @pl.when(j == last)
        def _():
            accumulate(masked=True)       # ragged tail only

    @pl.when(j == last)
    def _():
        sum_ref[...] = jnp.sum(sum_acc[...], axis=-1, keepdims=True)[None, :, :]
        sumsq_ref[...] = jnp.sum(sumsq_acc[...], axis=-1, keepdims=True)[None, :, :]
        max_ref[...] = jnp.max(max_acc[...], axis=-1, keepdims=True)[None, :, :]


def _apply_kernel(x_ref, scale_ref, shift_ref, out_ref):
    """out = x * scale[b,c] + shift[b,c]  (BN affine + channel gate pre-folded)."""
    # f32 math matches the reference on all generations (v5e VPU has no bf16).
    out_ref[...] = (
        x_ref[...].astype(jnp.float32) * scale_ref[...] + shift_ref[...]
    ).astype(out_ref.dtype)


def channel_se_layer_3d(x, w1, b1, w2, b2, gamma, beta):
    """x: (B, C, D, H, W).  w1: (C, Cr) (= fc1.weight.T), b1: (Cr,),
    w2: (Cr, C) (= fc2.weight.T), b2/gamma/beta: (C,)."""
    B, C, D, H, W = x.shape
    S = D * H * W
    xf = x.reshape(B, C, S)  # no host-side padding; ragged tail masked in-kernel

    # --- generation-aware tile / VMEM budgeting ------------------------------
    cap = _vmem_capacity_bytes()
    headroom = (16 << 20) if cap >= (96 << 20) else (12 << 20)
    tile_budget = min(8 << 20, max(1 << 20, (cap - headroom) // 4))  # pass 2: 4 big bufs
    tile_s = _choose_tile_s(S, C, tile_budget)
    num_tiles = pl.cdiv(S, tile_s)
    rem = S % tile_s                      # 0 => every tile full (no mask compiled)
    acc_lanes = min(LANES, tile_s)
    n_blk = tile_s // acc_lanes
    unroll = int(min(8, n_blk))

    elem_bytes = jnp.dtype(x.dtype).itemsize
    tile_bytes = C * tile_s * elem_bytes
    vmem_cap = cap - (8 << 20)
    vmem_stats = int(min(vmem_cap, max(8 << 20, 2 * tile_bytes + (4 << 20))))
    vmem_apply = int(min(vmem_cap, max(8 << 20, 4 * tile_bytes + (4 << 20))))

    # ---- pass 1: streamed stats (one read of x) -----------------------------
    stat_shape = jax.ShapeDtypeStruct((B, C, 1), jnp.float32)
    stat_spec = pl.BlockSpec((1, C, 1), lambda b, j: (b, 0, 0))
    sum_bc1, sumsq_bc1, max_bc1 = pl.pallas_call(
        functools.partial(_stats_kernel, tile_s=tile_s, rem=rem,
                          acc_lanes=acc_lanes, unroll=unroll),
        out_shape=(stat_shape, stat_shape, stat_shape),
        grid=(B, num_tiles),
        in_specs=[pl.BlockSpec((1, C, tile_s), lambda b, j: (b, 0, j))],
        out_specs=(stat_spec, stat_spec, stat_spec),
        scratch_shapes=[pltpu.VMEM((C, acc_lanes), jnp.float32),
                        pltpu.VMEM((C, acc_lanes), jnp.float32),
                        pltpu.VMEM((C, acc_lanes), jnp.float32)],
        compiler_params=pltpu.CompilerParams(
            dimension_semantics=("parallel", "arbitrary"),
            vmem_limit_bytes=vmem_stats,
        ),
    )(xf)
    # TODO(synk): on v7x with B == 1, add a second "parallel" grid axis splitting the
    # spatial tiles across the 2 TensorCores (per-half partial stats reduced here).

    sum_bc = sum_bc1[:, :, 0]                      # (B, C)
    avg = sum_bc * (1.0 / S)                       # (B, C)
    mx = max_bc1[:, :, 0]                          # (B, C)

    # ---- tiny excitation MLP + BN fold: plain JAX (negligible vs streaming) --
    stacked = jnp.concatenate([avg, mx], axis=0)                     # (2B, C)
    h = stacked @ w1 + b1[None, :]                                   # (2B, Cr)
    h = jnp.where(h >= 0, h, NEG_SLOPE * h)                          # LeakyReLU(0.1)
    fc = h @ w2 + b2[None, :]                                        # (2B, C)
    gate = jax.nn.sigmoid(fc[:B] + fc[B:])                           # (B, C)

    # BatchNorm3d (training mode, biased variance) from the streamed moments.
    n = B * S
    mean_c = jnp.sum(sum_bc, axis=0) * (1.0 / n)                     # (C,)
    ex2_c = jnp.sum(sumsq_bc1[:, :, 0], axis=0) * (1.0 / n)          # (C,)
    # TODO(synk): E[x^2]-mean^2 cancels for data with a large DC offset vs std;
    # switch to a shifted (pivoted) sumsq accumulation if inputs aren't centered.
    var_c = jnp.maximum(ex2_c - mean_c * mean_c, 0.0)                # (C,)
    inv_std = jax.lax.rsqrt(var_c + EPS)                             # (C,)
    scale_c = gamma * inv_std                                        # (C,)
    shift_c = beta - mean_c * scale_c                                # (C,)

    # Fold BN affine and the channel gate into a single per-(b,c) scale/shift.
    full_scale = (gate * scale_c[None, :]).reshape(B, C, 1).astype(jnp.float32)
    full_shift = (gate * shift_c[None, :]).reshape(B, C, 1).astype(jnp.float32)

    # ---- pass 2: streamed apply (one read + one write of x) -----------------
    out = pl.pallas_call(
        _apply_kernel,
        out_shape=jax.ShapeDtypeStruct((B, C, S), x.dtype),
        grid=(B, num_tiles),
        in_specs=[
            pl.BlockSpec((1, C, tile_s), lambda b, j: (b, 0, j)),
            pl.BlockSpec((1, C, 1), lambda b, j: (b, 0, 0)),
            pl.BlockSpec((1, C, 1), lambda b, j: (b, 0, 0)),
        ],
        out_specs=pl.BlockSpec((1, C, tile_s), lambda b, j: (b, 0, j)),
        compiler_params=pltpu.CompilerParams(
            dimension_semantics=("parallel", "parallel"),
            vmem_limit_bytes=vmem_apply,
        ),
    )(xf, full_scale, full_shift)

    return out.reshape(B, C, D, H, W)


def reference_se_layer_3d(x, w1, b1, w2, b2, gamma, beta):
    """Pure-JAX mirror of the PyTorch module (training-mode BatchNorm3d)."""
    B, C, D, H, W = x.shape
    xf = x.reshape(B, C, -1)
    avg = xf.mean(-1)
    mx = xf.max(-1)

    def excite(s):
        h = s @ w1 + b1
        h = jnp.where(h >= 0, h, NEG_SLOPE * h)
        return h @ w2 + b2

    gate = jax.nn.sigmoid(excite(avg) + excite(mx))
    mean_c = xf.mean(axis=(0, 2))
    var_c = ((xf - mean_c[None, :, None]) ** 2).mean(axis=(0, 2))
    xn = (xf - mean_c[None, :, None]) * jax.lax.rsqrt(var_c + EPS)[None, :, None]
    xn = xn * gamma[None, :, None] + beta[None, :, None]
    out = xn * gate[:, :, None]
    return out.reshape(B, C, D, H, W)


def _run_check(B, C, D, H, W, key):
    Cr = C // 2
    kx, k1, k2, k3, k4 = jax.random.split(key, 5)
    x = jax.random.normal(kx, (B, C, D, H, W), jnp.float32)
    w1 = jax.random.normal(k1, (C, Cr), jnp.float32) * 0.1   # fc1.weight.T
    b1 = jax.random.normal(k2, (Cr,), jnp.float32) * 0.1     # fc1.bias
    w2 = jax.random.normal(k3, (Cr, C), jnp.float32) * 0.1   # fc2.weight.T
    b2 = jax.random.normal(k4, (C,), jnp.float32) * 0.1      # fc2.bias
    gamma = jnp.ones((C,), jnp.float32)                      # BatchNorm3d weight
    beta = jnp.zeros((C,), jnp.float32)                      # BatchNorm3d bias

    out = channel_se_layer_3d(x, w1, b1, w2, b2, gamma, beta)
    out = jax.block_until_ready(out)
    ref = reference_se_layer_3d(x, w1, b1, w2, b2, gamma, beta)
    assert out.shape == (B, C, D, H, W)
    err = jnp.max(jnp.abs(out - ref))
    assert err < 1e-4, f"Pallas kernel mismatch vs JAX reference: {err}"


if __name__ == "__main__":
    key = jax.random.PRNGKey(0)
    k0, k1, k2 = jax.random.split(key, 3)
    _run_check(2, 8, 8, 8, 8, k0)   # single full tile (S=512, no masking)
    _run_check(2, 8, 5, 6, 7, k1)   # ragged spatial size (S=210, masked last tile)
    _run_check(1, 8, 4, 4, 4, k2)   # tiny spatial (S=64 < 128, single full block)
    print("KERNEL_OK")
</pallas_src>

<mosaic_0001>
module attributes {stable_mosaic.version = 11 : i64} {
  func.func @_stats_kernel(%arg0: i32, %arg1: i32, %arg2: memref<1x8x512xf32, #tpu.memory_space<vmem>>, %arg3: memref<1x8x1xf32, #tpu.memory_space<vmem>>, %arg4: memref<1x8x1xf32, #tpu.memory_space<vmem>>, %arg5: memref<1x8x1xf32, #tpu.memory_space<vmem>>, %arg6: memref<8x128xf32, #tpu.memory_space<vmem>>, %arg7: memref<8x128xf32, #tpu.memory_space<vmem>>, %arg8: memref<8x128xf32, #tpu.memory_space<vmem>>) attributes {dimension_semantics = [#tpu.dimension_semantics<parallel>, #tpu.dimension_semantics<arbitrary>], iteration_bounds = array<i64: 2, 1>, scalar_prefetch = 0 : i64, scratch_operands = 3 : i64, tpu.core_type = #tpu.core_type<tc>, window_params = [{transform_indices = @transform_0, window_bounds = array<i64: 1, 8, 512>}, {transform_indices = @transform_1, window_bounds = array<i64: 1, 8, 1>}, {transform_indices = @transform_2, window_bounds = array<i64: 1, 8, 1>}, {transform_indices = @transform_3, window_bounds = array<i64: 1, 8, 1>}]} {
    %c0_i32 = arith.constant 0 : i32
    %0 = arith.cmpi eq, %arg1, %c0_i32 : i32
    %1 = arith.extui %0 : i1 to i32
    %c0_i32_0 = arith.constant 0 : i32
    %2 = arith.cmpi ne, %1, %c0_i32_0 : i32
    scf.if %2 {
      %cst_28 = arith.constant 0.000000e+00 : f32
      %54 = vector.broadcast %cst_28 : f32 to vector<8x128xf32>
      %c0_29 = arith.constant 0 : index
      %c0_30 = arith.constant 0 : index
      %55 = vector.load %arg6[%c0_29, %c0_30] : memref<8x128xf32, #tpu.memory_space<vmem>>, vector<8x128xf32>
      tpu.vector_store %arg6[%c0_29, %c0_30], %54 {strides = array<i32>} : memref<8x128xf32, #tpu.memory_space<vmem>>, vector<8x128xf32>,
      %cst_31 = arith.constant 0.000000e+00 : f32
      %56 = vector.broadcast %cst_31 : f32 to vector<8x128xf32>
      %c0_32 = arith.constant 0 : index
      %c0_33 = arith.constant 0 : index
      %57 = vector.load %arg7[%c0_32, %c0_33] : memref<8x128xf32, #tpu.memory_space<vmem>>, vector<8x128xf32>
      tpu.vector_store %arg7[%c0_32, %c0_33], %56 {strides = array<i32>} : memref<8x128xf32, #tpu.memory_space<vmem>>, vector<8x128xf32>,
      %cst_34 = arith.constant 0xFF800000 : f32
      %58 = vector.broadcast %cst_34 : f32 to vector<8x128xf32>
      %c0_35 = arith.constant 0 : index
      %c0_36 = arith.constant 0 : index
      %59 = vector.load %arg8[%c0_35, %c0_36] : memref<8x128xf32, #tpu.memory_space<vmem>>, vector<8x128xf32>
      tpu.vector_store %arg8[%c0_35, %c0_36], %58 {strides = array<i32>} : memref<8x128xf32, #tpu.memory_space<vmem>>, vector<8x128xf32>,
    } else {
    }
    %cst = arith.constant 0.000000e+00 : f32
    %3 = vector.broadcast %cst : f32 to vector<8x128xf32>
    %cst_1 = arith.constant 0.000000e+00 : f32
    %4 = vector.broadcast %cst_1 : f32 to vector<8x128xf32>
    %cst_2 = arith.constant 0xFF800000 : f32
    %5 = vector.broadcast %cst_2 : f32 to vector<8x128xf32>
    %c0_i32_3 = arith.constant 0 : i32
    %c128_i32 = arith.constant 128 : i32
    %6 = arith.muli %c0_i32_3, %c128_i32 : i32
    %7 = tpu.assume_multiple %6, 128 : i32
    %c0 = arith.constant 0 : index
    %c0_4 = arith.constant 0 : index
    %8 = arith.index_cast %7 : i32 to index
    %9 = vector.load %arg2[%c0, %c0_4, %8] : memref<1x8x512xf32, #tpu.memory_space<vmem>>, vector<1x8x128xf32>
    %10 = vector.shape_cast %9 : vector<1x8x128xf32> to vector<8x128xf32>
    %11 = arith.addf %3, %10 : vector<8x128xf32>
    %12 = arith.mulf %10, %10 : vector<8x128xf32>
    %13 = arith.addf %4, %12 : vector<8x128xf32>
    %14 = arith.maximumf %5, %10 : vector<8x128xf32>
    %c1_i32 = arith.constant 1 : i32
    %c128_i32_5 = arith.constant 128 : i32
    %15 = arith.muli %c1_i32, %c128_i32_5 : i32
    %16 = tpu.assume_multiple %15, 128 : i32
    %c0_6 = arith.constant 0 : index
    %c0_7 = arith.constant 0 : index
    %17 = arith.index_cast %16 : i32 to index
    %18 = vector.load %arg2[%c0_6, %c0_7, %17] : memref<1x8x512xf32, #tpu.memory_space<vmem>>, vector<1x8x128xf32>
    %19 = vector.shape_cast %18 : vector<1x8x128xf32> to vector<8x128xf32>
    %20 = arith.addf %11, %19 : vector<8x128xf32>
    %21 = arith.mulf %19, %19 : vector<8x128xf32>
    %22 = arith.addf %13, %21 : vector<8x128xf32>
    %23 = arith.maximumf %14, %19 : vector<8x128xf32>
    %c2_i32 = arith.constant 2 : i32
    %c128_i32_8 = arith.constant 128 : i32
    %24 = arith.muli %c2_i32, %c128_i32_8 : i32
    %25 = tpu.assume_multiple %24, 128 : i32
    %c0_9 = arith.constant 0 : index
    %c0_10 = arith.constant 0 : index
    %26 = arith.index_cast %25 : i32 to index
    %27 = vector.load %arg2[%c0_9, %c0_10, %26] : memref<1x8x512xf32, #tpu.memory_space<vmem>>, vector<1x8x128xf32>
    %28 = vector.shape_cast %27 : vector<1x8x128xf32> to vector<8x128xf32>
    %29 = arith.addf %20, %28 : vector<8x128xf32>
    %30 = arith.mulf %28, %28 : vector<8x128xf32>
    %31 = arith.addf %22, %30 : vector<8x128xf32>
    %32 = arith.maximumf %23, %28 : vector<8x128xf32>
    %c3_i32 = arith.constant 3 : i32
    %c128_i32_11 = arith.constant 128 : i32
    %33 = arith.muli %c3_i32, %c128_i32_11 : i32
    %34 = tpu.assume_multiple %33, 128 : i32
    %c0_12 = arith.constant 0 : index
    %c0_13 = arith.constant 0 : index
    %35 = arith.index_cast %34 : i32 to index
    %36 = vector.load %arg2[%c0_12, %c0_13, %35] : memref<1x8x512xf32, #tpu.memory_space<vmem>>, vector<1x8x128xf32>
    %37 = vector.shape_cast %36 : vector<1x8x128xf32> to vector<8x128xf32>
    %38 = arith.addf %29, %37 : vector<8x128xf32>
    %39 = arith.mulf %37, %37 : vector<8x128xf32>
    %40 = arith.addf %31, %39 : vector<8x128xf32>
    %41 = arith.maximumf %32, %37 : vector<8x128xf32>
    %c4_i32 = arith.constant 4 : i32
    %c0_14 = arith.constant 0 : index
    %c0_15 = arith.constant 0 : index
    %42 = vector.load %arg6[%c0_14, %c0_15] : memref<8x128xf32, #tpu.memory_space<vmem>>, vector<8x128xf32>
    %43 = arith.addf %42, %38 : vector<8x128xf32>
    %c0_16 = arith.constant 0 : index
    %c0_17 = arith.constant 0 : index
    %44 = vector.load %arg6[%c0_16, %c0_17] : memref<8x128xf32, #tpu.memory_space<vmem>>, vector<8x128xf32>
    tpu.vector_store %arg6[%c0_16, %c0_17], %43 {strides = array<i32>} : memref<8x128xf32, #tpu.memory_space<vmem>>, vector<8x128xf32>,
    %c0_18 = arith.constant 0 : index
    %c0_19 = arith.constant 0 : index
    %45 = vector.load %arg7[%c0_18, %c0_19] : memref<8x128xf32, #tpu.memory_space<vmem>>, vector<8x128xf32>
    %46 = arith.addf %45, %40 : vector<8x128xf32>
    %c0_20 = arith.constant 0 : index
    %c0_21 = arith.constant 0 : index
    %47 = vector.load %arg7[%c0_20, %c0_21] : memref<8x128xf32, #tpu.memory_space<vmem>>, vector<8x128xf32>
    tpu.vector_store %arg7[%c0_20, %c0_21], %46 {strides = array<i32>} : memref<8x128xf32, #tpu.memory_space<vmem>>, vector<8x128xf32>,
    %c0_22 = arith.constant 0 : index
    %c0_23 = arith.constant 0 : index
    %48 = vector.load %arg8[%c0_22, %c0_23] : memref<8x128xf32, #tpu.memory_space<vmem>>, vector<8x128xf32>
    %49 = arith.maximumf %48, %41 : vector<8x128xf32>
    %c0_24 = arith.constant 0 : index
    %c0_25 = arith.constant 0 : index
    %50 = vector.load %arg8[%c0_24, %c0_25] : memref<8x128xf32, #tpu.memory_space<vmem>>, vector<8x128xf32>
    tpu.vector_store %arg8[%c0_24, %c0_25], %49 {strides = array<i32>} : memref<8x128xf32, #tpu.memory_space<vmem>>, vector<8x128xf32>,
    %c0_i32_26 = arith.constant 0 : i32
    %51 = arith.cmpi eq, %arg1, %c0_i32_26 : i32
    %52 = arith.extui %51 : i1 to i32
    %c0_i32_27 = arith.constant 0 : i32
    %53 = arith.cmpi ne, %52, %c0_i32_27 : i32
    scf.if %53 {
      %c0_28 = arith.constant 0 : index
      %c0_29 = arith.constant 0 : index
      %54 = vector.load %arg6[%c0_28, %c0_29] : memref<8x128xf32, #tpu.memory_space<vmem>>, vector<8x128xf32>
      %cst_30 = arith.constant dense<0.000000e+00> : vector<8xf32>
      %55 = vector.multi_reduction <add>, %54, %cst_30 [1] : vector<8x128xf32> to vector<8xf32>
      %56 = vector.shape_cast %55 : vector<8xf32> to vector<8x1xf32>
      %57 = vector.shape_cast %56 : vector<8x1xf32> to vector<1x8x1xf32>
      %c0_31 = arith.constant 0 : index
      %c0_32 = arith.constant 0 : index
      %c0_33 = arith.constant 0 : index
      %58 = vector.load %arg3[%c0_31, %c0_32, %c0_33] : memref<1x8x1xf32, #tpu.memory_space<vmem>>, vector<1x8x1xf32>
      tpu.vector_store %arg3[%c0_31, %c0_32, %c0_33], %57 {strides = array<i32>} : memref<1x8x1xf32, #tpu.memory_space<vmem>>, vector<1x8x1xf32>,
      %c0_34 = arith.constant 0 : index
      %c0_35 = arith.constant 0 : index
      %59 = vector.load %arg7[%c0_34, %c0_35] : memref<8x128xf32, #tpu.memory_space<vmem>>, vector<8x128xf32>
      %cst_36 = arith.constant dense<0.000000e+00> : vector<8xf32>
      %60 = vector.multi_reduction <add>, %59, %cst_36 [1] : vector<8x128xf32> to vector<8xf32>
      %61 = vector.shape_cast %60 : vector<8xf32> to vector<8x1xf32>
      %62 = vector.shape_cast %61 : vector<8x1xf32> to vector<1x8x1xf32>
      %c0_37 = arith.constant 0 : index
      %c0_38 = arith.constant 0 : index
      %c0_39 = arith.constant 0 : index
      %63 = vector.load %arg4[%c0_37, %c0_38, %c0_39] : memref<1x8x1xf32, #tpu.memory_space<vmem>>, vector<1x8x1xf32>
      tpu.vector_store %arg4[%c0_37, %c0_38, %c0_39], %62 {strides = array<i32>} : memref<1x8x1xf32, #tpu.memory_space<vmem>>, vector<1x8x1xf32>,
      %c0_40 = arith.constant 0 : index
      %c0_41 = arith.constant 0 : index
      %64 = vector.load %arg8[%c0_40, %c0_41] : memref<8x128xf32, #tpu.memory_space<vmem>>, vector<8x128xf32>
      %cst_42 = arith.constant dense<0xFF800000> : vector<8xf32>
      %65 = vector.multi_reduction <maximumf>, %64, %cst_42 [1] : vector<8x128xf32> to vector<8xf32>
      %66 = vector.shape_cast %65 : vector<8xf32> to vector<8x1xf32>
      %67 = vector.shape_cast %66 : vector<8x1xf32> to vector<1x8x1xf32>
      %c0_43 = arith.constant 0 : index
      %c0_44 = arith.constant 0 : index
      %c0_45 = arith.constant 0 : index
      %68 = vector.load %arg5[%c0_43, %c0_44, %c0_45] : memref<1x8x1xf32, #tpu.memory_space<vmem>>, vector<1x8x1xf32>
      tpu.vector_store %arg5[%c0_43, %c0_44, %c0_45], %67 {strides = array<i32>} : memref<1x8x1xf32, #tpu.memory_space<vmem>>, vector<1x8x1xf32>,
    } else {
    }
    return
  }
  func.func @transform_0(%arg0: i32, %arg1: i32) -> (i32, i32, i32) {
    %c0_i32 = arith.constant 0 : i32
    %c0_i32_0 = arith.constant 0 : i32
    return %arg0, %c0_i32, %arg1 : i32, i32, i32
  }
  func.func @transform_1(%arg0: i32, %arg1: i32) -> (i32, i32, i32) {
    %c0_i32 = arith.constant 0 : i32
    %c0_i32_0 = arith.constant 0 : i32
    %c0_i32_1 = arith.constant 0 : i32
    return %arg0, %c0_i32, %c0_i32_0 : i32, i32, i32
  }
  func.func @transform_2(%arg0: i32, %arg1: i32) -> (i32, i32, i32) {
    %c0_i32 = arith.constant 0 : i32
    %c0_i32_0 = arith.constant 0 : i32
    %c0_i32_1 = arith.constant 0 : i32
    return %arg0, %c0_i32, %c0_i32_0 : i32, i32, i32
  }
  func.func @transform_3(%arg0: i32, %arg1: i32) -> (i32, i32, i32) {
    %c0_i32 = arith.constant 0 : i32
    %c0_i32_0 = arith.constant 0 : i32
    %c0_i32_1 = arith.constant 0 : i32
    return %arg0, %c0_i32, %c0_i32_0 : i32, i32, i32
  }
}

</mosaic_0001>

<bundles_post_ra>
// kernel: tpu_custom_call.1
= control target key start
LH: loop header
LB: loop body
LE: loop exit
PB: predicated region body
PF: predicated region fallthrough
CT: control target
= control target key end

     0   :  { %9 = vsyncpa [#allocation6], 0  ;;  %s724_s0 = inlined_call_operand.hbm [shape: f32[2,8,512], index: 0, kind: input, shape index: {}]   ;;  %s725_s1 = inlined_call_operand.vmem [shape: f32[2,8,1], index: 1, kind: output, shape index: {0}]   ;;  %s726_s2 = inlined_call_operand.vmem [shape: f32[2,8,1], index: 2, kind: output, shape index: {1}]   ;;  %s727_s3 = inlined_call_operand.vmem [shape: f32[2,8,1], index: 3, kind: output, shape index: {2}]  }
   0x1   :  { %11 = vsyncpa [#allocation6 + $0x1], 0  ;;  %s593_s12 = smov 0   ;;  %s595_s13 = smov 0  }
   0x2   :  { %s597_s14 = smov 0   ;;  %s599_s15 = smov 0  }
   0x3   :  { %s601_s16 = smov 0   ;;  %s603_s17 = smov 0  }
   0x4 LB: > { %s417_s18 = sadd.s32 4294967295, %s570_s17   ;;  %s29_s19 = sadd.s32 1, %s566_s16  ;;  %s570_s17 = sphi %s603_s17, %s17_s17   ;;  %s566_s16 = sphi %s601_s16, %s737_s16   ;;  %s562_s15 = sphi %s599_s15, %s736_s15   ;;  %s558_s14 = sphi %s597_s14, %s735_s14   ;;  %s554_s13 = sphi %s595_s13, %s734_s13   ;;  %s550_s12 = sphi %s593_s12, %s733_s12  }
   0x5   : > { %p31_p0 = scmp.ge.s32.totalorder %s29_s19, 2  ;;  %s38_s20 = sadd.s32 1, %s558_s14 }
   0x6   : > { %p45_p1 = scmp.ne.s32.totalorder %s558_s14, %s554_s13  ;;  %p46_p2 = scmp.eq.s32.totalorder %s570_s17, 0 }
   0x7   : > { %s739_s19 = smov (%p31_p0, %s29_s19), 0  ;;  %p51_p4 = scmp.ne.s32.totalorder %s554_s13, %s550_s12 }
   0x8   : > { %p629_p3 = por %p46_p2, %p45_p1  ;;  %s33_s22 = ssub.s32 %s566_s16, %s739_s19 }
   0x9   : > { %p52_p5 = scmp.eq.s32.totalorder %s417_s18, 0  ;;  %p36_p6 = scmp.eq.s32.totalorder %s33_s22, 0 }
   0xa   : > { %p441_p8 = scmp.lt.s32.totalorder %s570_s17, 2  ;;  %s153_s25 = sand.u32 1, %s558_s14  }
   0xb   : > { %p636_p7 = por %p52_p5, %p51_p4  ;;  %s434_s26 = sshll.u32 %s566_s16, 9 }
   0xc   : > { %s642_s24 = scalar_select %p36_p6, %s558_s14, %s38_s20  }
   0xd   : > { %s421_s27 = sshll.u32 %s153_s25, 5  ;;  %s649_s30 = scalar_lea.hbm %s724_s0, %s434_s26 }
   0xe   : > { %s157_s4 = scalar_lea.vmem [#allocation5], %s421_s27  ;;  %p653_p9 = pnand %p441_p8, %p629_p3 }
   0xf   : > { %s167_s5 = sshll.u32 %s157_s4, 4  ;;  %s154_s7 = scalar_lea.sflag [#allocation6], %s153_s25  ;;  %s657_s5 = int_to_ptr.vmem [resolvable:$true] %s167_s5 }
  0x10   : > { %s490_s8 = scalar_lea.hbm %s649_s30, 512  ;;  %p492_p13 = pneg %p653_p9 }
  0x11   : > { %p491_p12 = scmp.ne.s32.totalorder %s649_s30, %s490_s8  ;;  %s495_s11 = scalar_lea.hbm %s724_s0, 1024 }
  0x12   : > { %p496_p2 = scmp.lt.u32.totalorder %s649_s30, %s724_s0  ;;  %p497_p3 = scmp.lt.u32.totalorder %s495_s11, %s490_s8 }
  0x13   : > { %p493_p0 = pnand %p492_p13, %p491_p12  ;;  %p499_p5 = scmp.lt.u32.totalorder %s490_s8, %s649_s30 }
  0x14   : > { %p498_p4 = por %p497_p3, %p496_p2 }
  0x15   : > { %p494_p1 = pneg %p493_p0 }
  0x16   : > { %p500_p6 = por %p499_p5, %p498_p4 }
  0x18   : > { %p501_p8 = pnand %p500_p6, %p494_p1 }
  0x1a   : > { %504 = shalt.err (!%p501_p8)
}
  0x1b   : > { %s505_s20 = scalar_lea.vmem %s657_s5, 512  ;;  %s572_s21 = smov [#allocation5]  }
  0x1c   : > { %p506_p12 = scmp.ne.s32.totalorder %s657_s5, %s505_s20  ;;  %s510_s22 = sshll.u32 %s572_s21, 4  ;;  %s511_s22 = int_to_ptr.vmem [resolvable:$false] %s510_s22 }
  0x1d   : > { %s512_s25 = scalar_lea.vmem %s511_s22, 1024  ;;  %p513_p11 = scmp.lt.s32.totalorder %s657_s5, %s511_s22 }
  0x1e   : > { %p508_p0 = pnand %p506_p12, %p492_p13  ;;  %p514_p2 = scmp.lt.s32.totalorder %s512_s25, %s505_s20 }
  0x20   : > { %p509_p10 = pneg %p508_p0  ;;  %p515_p3 = por %p514_p2, %p513_p11 }
  0x22   : > { %p516_p4 = pnand %p515_p3, %p509_p10 }
  0x24   : > { %519 = shalt.err (!%p516_p4)
}
  0x25   : > { %440 = dma.hbm_to_vmem [thread:$0]  (!%p653_p9), %s649_s30, 512, %s657_s5, %s154_s7  }
  0x26   : > { %p731_p1 = scmp.lt.s32.totalorder %s570_s17, 3  ;;  %p732_p5 = scmp.ge.s32.totalorder %s570_s17, 1 }
  0x28   : > { %p173_p13 = pnand %p732_p5, %p731_p1 }
  0x29   : > { %s178_s26 = sand.u32 (!%p173_p13), 1, %s554_s13  }
  0x2a   : > { %176 = sbr.rel (%p173_p13) target bundleno = 204 (0xcc), region = 24  ;;  %s425_s27 = sshll.u32 (!%p173_p13), %s178_s26, 5 }
  0x2b   : > { %s179_s28 = scalar_lea.sflag (!%p173_p13), [#allocation6], %s178_s26  ;;  %s182_s29 = scalar_lea.vmem (!%p173_p13), [#allocation5], %s425_s27 }
  0x31   : > { %545 = dma.done.wait (%p636_p7), %s179_s28, 512  }
  0x32   : > { %547 = vsyncadd (%p636_p7), %s179_s28, 4294966784  ;;  %v232_v0 = vld [vmem:[%s182_s29] sm:$0xff]  ;;  %v429_v1 = vld [vmem:[%s182_s29 + $0x8] sm:$0xff]  ;;  %p213_p7 = scmp.lt.s32.totalorder %s562_s15, 1  ;;  %vm269_vm0 = vcmask 7168  }
  0x33   : > { %v430_v2 = vld [vmem:[%s182_s29 + $0x10] sm:$0xff]  ;;  %v238_v3 = vadd.f32 %v429_v1, %v232_v0  ;;  %v241_v4 = vmax.f32 %v232_v0, %v429_v1  ;;  %v234_v5 = vmul.f32 %v232_v0, %v232_v0  ;;  %v239_v6 = vmul.f32 %v429_v1, %v429_v1  ;;  %v431_v7 = vld [vmem:[%s182_s29 + $0x18] sm:$0xff] }
  0x34   : > { %v245_v8 = vmul.f32 %v430_v2, %v430_v2  ;;  %v251_v12 = vmul.f32 %v431_v7, %v431_v7  ;;  %s741_s15 = smov (!%p213_p7, %s562_s15), 1 }
  0x35   : > { %v244_v9 = vadd.f32 %v430_v2, %v238_v3  ;;  %v247_v10 = vmax.f32 %v241_v4, %v430_v2  ;;  %v240_v11 = vadd.f32 %v239_v6, %v234_v5  ;;  %s426_s23 = sshll.u32 %s741_s15, 3 }
  0x36   : > { %s216_s5 = scalar_lea.vmem %s725_s1, %s426_s23  ;;  %s224_s8 = scalar_lea.vmem %s727_s3, %s426_s23 }
  0x37   : > { %v250_v13 = vadd.f32 %v431_v7, %v244_v9  ;;  %v253_v14 = vmax.f32 %v247_v10, %v431_v7  ;;  %v246_v15 = vadd.f32 %v245_v8, %v240_v11  ;;  %s220_s11 = scalar_lea.vmem %s726_s2, %s426_s23 }
  0x39   : > { %267 = vadd.xlane.f32.xlu0 %v250_v13  ;;  %276 = vmax.xlane.f32.xlu1 %v253_v14  ;;  %v252_v16 = vadd.f32 %v251_v12, %v246_v15 }
  0x3d   : > { %272 = vadd.xlane.f32.xlu0 %v252_v16 }
  0xc6   : > { %v268_v17 = vpop.xlane.xlu0 %267  ;;  %v277_v18 = vpop.xlane.xlu1 %276 }
  0xc7   : > { %270 = vst.msk [vmem:[%s216_s5] sm:$0xff] %vm269_vm0, %v268_v17  ;;  %278 = vst.msk [vmem:[%s224_s8] sm:$0xff] %vm269_vm0, %v277_v18 }
  0xca   : > { %v273_v19 = vpop.xlane.xlu0 %272 }
  0xcb   : > { %274 = vst.msk [vmem:[%s220_s11] sm:$0xff] %vm269_vm0, %v273_v19 }
  0xcc PF: > { %s17_s17 = sadd.s32 1, %s570_s17   ;;  %s733_s12 = smov %s554_s13 }
  0xcd   : > { %p14_p9 = scmp.ge.s32.totalorder %s17_s17, 4   ;;  %s734_s13 = smov %s558_s14 }
  0xce   : > { %s735_s14 = smov %s642_s24  ;;  %s736_s15 = smov %s566_s16 }
  0xcf   : > { %s737_s16 = smov %s739_s19  ;;  %16 = sbr.rel (!%p14_p9) target bundleno = 4 (0x4), region = 99 }
  0xd6   :  { %326 = vsyncpa [#allocation6], 1 }
  0xd7   :  { %328 = vsyncpa [#allocation6 + $0x1], 1 }

</bundles_post_ra>
